<compile_context>
chip_gen: v5e
topology: v5e:2x2
jax: 0.10.0
libtpu: 0.0.40
codegen_flags: <defaults>
</compile_context>

<pallas_src>
import functools

import jax
import jax.numpy as jnp
from jax.experimental import pallas as pl
from jax.experimental.pallas import tpu as pltpu


def _loss_kernel(scal_ref, p_ref, P_ref, A_ref, sig_ref, out_ref, acc_ref, *,
                 reg_type):
    """One row-tile of the loss.  Grid axis 0 is the (reduction) row-tile axis.

    scal_ref : SMEM (3,) f32  -> [radius^2, dimension, reg_strength]
    p_ref    : VMEM (1, N)    -> data proportions (broadcast over rows here)
    P_ref    : VMEM (TM, N)   -> topology mask tile
    A_ref    : VMEM (TM, N)   -> mixing-weight tile
    sig_ref  : VMEM (TM, N)   -> per-edge noise-std tile
    out_ref  : SMEM (1, 1)    -> scalar loss (written on last step only)
    acc_ref  : VMEM (TM, N)   -> f32 elementwise accumulator scratch
    """
    step = pl.program_id(0)

    @pl.when(step == 0)
    def _():
        acc_ref[...] = jnp.zeros_like(acc_ref)

    r2 = scal_ref[0]
    dim = scal_ref[1]
    reg = scal_ref[2]

    A = A_ref[...]
    A_m = jnp.where(P_ref[...] > 0, A, jnp.zeros_like(A))
    diff = A_m - p_ref[...]            # (TM, N) - (1, N) broadcast in-kernel
    sq_bias = diff * diff
    noise_amp = A_m * sig_ref[...]
    var_term = noise_amp * noise_amp

    # Fold scalar coefficients into one elementwise expression (VPU only);
    # the single cross-lane reduction happens once, at the end.
    if reg_type == 'L2':
        combined = (r2 + reg) * sq_bias + dim * var_term
    else:  # 'L1'
        combined = r2 * sq_bias + dim * var_term + reg * jnp.abs(diff)

    acc_ref[...] += combined

    @pl.when(step == pl.num_programs(0) - 1)
    def _():
        out_ref[0, 0] = jnp.sum(acc_ref[...])


def _pick_row_tile(n):
    """Row-tile size: 3 inputs x 2 buffers x (tm, n) f32 kept ~<= 8 MiB so the
    pipeline fits comfortably even on v7x (64 MiB physical VMEM)."""
    budget_rows = max(8, (8 * 1024 * 1024) // (24 * n))
    if n <= budget_rows:
        return n
    for tm in (512, 256, 128, 64, 32, 16, 8):
        if tm <= budget_rows and n % tm == 0:
            return tm
    return n  # fallback: whole array in one step


def forward_loss(p, P, A, sigma, *, radius, dimension, reg_type, reg_strength):
    """Full forward pass of Model.forward() as one Pallas call."""
    n = P.shape[0]
    tm = _pick_row_tile(n)
    grid = (n // tm,)

    p2d = p.reshape(1, n).astype(jnp.float32)
    P = P.astype(jnp.float32)
    A = A.astype(jnp.float32)
    sigma = sigma.astype(jnp.float32)
    scalars = jnp.array(
        [float(radius) ** 2, float(dimension), float(reg_strength)],
        dtype=jnp.float32)

    kernel = functools.partial(_loss_kernel, reg_type=reg_type)

    out = pl.pallas_call(
        kernel,
        out_shape=jax.ShapeDtypeStruct((1, 1), jnp.float32),
        grid=grid,
        in_specs=[
            pl.BlockSpec(memory_space=pltpu.MemorySpace.SMEM),      # scalars
            pl.BlockSpec((1, n), lambda i: (0, 0)),                 # p (1, N)
            pl.BlockSpec((tm, n), lambda i: (i, 0)),                # P tile
            pl.BlockSpec((tm, n), lambda i: (i, 0)),                # A tile
            pl.BlockSpec((tm, n), lambda i: (i, 0)),                # sigma tile
        ],
        out_specs=pl.BlockSpec(memory_space=pltpu.MemorySpace.SMEM),
        scratch_shapes=[pltpu.VMEM((tm, n), jnp.float32)],
        compiler_params=pltpu.CompilerParams(
            dimension_semantics=("arbitrary",)),
    )(scalars, p2d, P, A, sigma)
    return out[0, 0]


def init_model_params(key, num_clients, P, E, D, radius):
    """Deterministic re-implementation of Model.__init__ parameter setup."""
    weights = jax.random.uniform(key, (num_clients, num_clients),
                                 dtype=jnp.float32, minval=0.0, maxval=0.1)
    weights = jnp.where(P > 0, weights, 0.0)
    # B[i,j] = 2*radius/E[i,j] * sqrt(2*log(1.25/D[i,j]));  noise = weights * B
    B = 2.0 * radius / E * jnp.sqrt(2.0 * jnp.log(1.25 / D))
    noise = weights * B
    return weights, noise


def reference_loss(p, P, A, sigma, radius, dimension, reg_type, reg_strength):
    """Pure-JAX reference (same math as the kernel) for sanity checking."""
    A_m = jnp.where(P > 0, A, 0.0)
    diff = A_m - p[None, :]
    mse = radius ** 2 * jnp.sum(diff ** 2) + dimension * jnp.sum(
        A_m ** 2 * sigma ** 2)
    if reg_type == 'L2':
        reg = reg_strength * jnp.sum(diff ** 2)
    else:
        reg = reg_strength * jnp.sum(jnp.abs(diff))
    return mse + reg


if __name__ == "__main__":
    key = jax.random.PRNGKey(0)
    k_w, k_p, k_e = jax.random.split(key, 3)

    num_clients = 8
    radius = 1.0
    dimension = 128
    reg_type = 'L2'
    reg_strength = 0.0

    # p: client data proportions (sum to 1)
    p_raw = jax.random.uniform(k_p, (num_clients,), dtype=jnp.float32,
                               minval=0.5, maxval=1.5)
    p = p_raw / jnp.sum(p_raw)

    # P: ring topology with self-loops (binary adjacency)
    idx = jnp.arange(num_clients)
    P = ((idx[:, None] == idx[None, :]) |
         (idx[:, None] == (idx[None, :] + 1) % num_clients) |
         (idx[:, None] == (idx[None, :] - 1) % num_clients)).astype(jnp.float32)

    # E: per-edge privacy budgets (epsilon), D: per-edge delta
    E = jax.random.uniform(k_e, (num_clients, num_clients), dtype=jnp.float32,
                           minval=1.0, maxval=10.0)
    D = jnp.full((num_clients, num_clients), 1e-5, dtype=jnp.float32)

    weights, noise = init_model_params(k_w, num_clients, P, E, D, radius)

    loss = forward_loss(p, P, weights, noise, radius=radius,
                        dimension=dimension, reg_type=reg_type,
                        reg_strength=reg_strength)
    loss = jax.block_until_ready(loss)

    ref = reference_loss(p, P, weights, noise, radius, dimension,
                         reg_type, reg_strength)
    assert jnp.allclose(loss, ref, rtol=1e-5, atol=1e-5), (loss, ref)

    # Also check the L1 regularizer branch.
    loss_l1 = forward_loss(p, P, weights, noise, radius=radius,
                           dimension=dimension, reg_type='L1',
                           reg_strength=0.01)
    loss_l1 = jax.block_until_ready(loss_l1)
    ref_l1 = reference_loss(p, P, weights, noise, radius, dimension,
                            'L1', 0.01)
    assert jnp.allclose(loss_l1, ref_l1, rtol=1e-5, atol=1e-5), (loss_l1, ref_l1)

    print("KERNEL_OK")
</pallas_src>

<mosaic_0001>
module attributes {stable_mosaic.version = 11 : i64} {
  func.func @_loss_kernel(%arg0: i32, %arg1: memref<3xf32, #tpu.memory_space<smem>>, %arg2: memref<1x8xf32, #tpu.memory_space<vmem>>, %arg3: memref<8x8xf32, #tpu.memory_space<vmem>>, %arg4: memref<8x8xf32, #tpu.memory_space<vmem>>, %arg5: memref<8x8xf32, #tpu.memory_space<vmem>>, %arg6: memref<1x1xf32, #tpu.memory_space<smem>>, %arg7: memref<8x8xf32, #tpu.memory_space<vmem>>) attributes {dimension_semantics = [#tpu.dimension_semantics<arbitrary>], iteration_bounds = array<i64: 1>, scalar_prefetch = 0 : i64, scratch_operands = 1 : i64, tpu.core_type = #tpu.core_type<tc>, window_params = [{transform_indices = @transform_0, window_bounds = array<i64: 3>}, {pipeline_mode = #tpu.pipeline_mode<synchronous>, transform_indices = @transform_1, window_bounds = array<i64: 1, 8>}, {transform_indices = @transform_2, window_bounds = array<i64: 8, 8>}, {transform_indices = @transform_3, window_bounds = array<i64: 8, 8>}, {transform_indices = @transform_4, window_bounds = array<i64: 8, 8>}, {transform_indices = @transform_5, window_bounds = array<i64: 1, 1>}]} {
    %c0_i32 = arith.constant 0 : i32
    %0 = arith.cmpi eq, %arg0, %c0_i32 : i32
    %1 = arith.extui %0 : i1 to i32
    %c0_i32_0 = arith.constant 0 : i32
    %2 = arith.cmpi ne, %1, %c0_i32_0 : i32
    scf.if %2 {
      %cst_16 = arith.constant 0.000000e+00 : f32
      %31 = vector.broadcast %cst_16 : f32 to vector<8x8xf32>
      %c0_17 = arith.constant 0 : index
      %c0_18 = arith.constant 0 : index
      %32 = vector.load %arg7[%c0_17, %c0_18] : memref<8x8xf32, #tpu.memory_space<vmem>>, vector<8x8xf32>
      tpu.vector_store %arg7[%c0_17, %c0_18], %31 {strides = array<i32>} : memref<8x8xf32, #tpu.memory_space<vmem>>, vector<8x8xf32>,
    } else {
    }
    %c0 = arith.constant 0 : index
    %3 = memref.load %arg1[%c0] : memref<3xf32, #tpu.memory_space<smem>>
    %c1 = arith.constant 1 : index
    %4 = memref.load %arg1[%c1] : memref<3xf32, #tpu.memory_space<smem>>
    %c2 = arith.constant 2 : index
    %5 = memref.load %arg1[%c2] : memref<3xf32, #tpu.memory_space<smem>>
    %c0_1 = arith.constant 0 : index
    %c0_2 = arith.constant 0 : index
    %6 = vector.load %arg4[%c0_1, %c0_2] : memref<8x8xf32, #tpu.memory_space<vmem>>, vector<8x8xf32>
    %c0_3 = arith.constant 0 : index
    %c0_4 = arith.constant 0 : index
    %7 = vector.load %arg3[%c0_3, %c0_4] : memref<8x8xf32, #tpu.memory_space<vmem>>, vector<8x8xf32>
    %cst = arith.constant 0.000000e+00 : f32
    %8 = vector.broadcast %cst : f32 to vector<8x8xf32>
    %9 = arith.cmpf ogt, %7, %8 : vector<8x8xf32>
    %cst_5 = arith.constant 0.000000e+00 : f32
    %10 = vector.broadcast %cst_5 : f32 to vector<8x8xf32>
    %11 = arith.select %9, %6, %10 : vector<8x8xi1>, vector<8x8xf32>
    %c0_6 = arith.constant 0 : index
    %c0_7 = arith.constant 0 : index
    %12 = vector.load %arg2[%c0_6, %c0_7] : memref<1x8xf32, #tpu.memory_space<vmem>>, vector<1x8xf32>
    %13 = vector.broadcast %12 : vector<1x8xf32> to vector<8x8xf32>
    %14 = arith.subf %11, %13 : vector<8x8xf32>
    %15 = arith.mulf %14, %14 : vector<8x8xf32>
    %c0_8 = arith.constant 0 : index
    %c0_9 = arith.constant 0 : index
    %16 = vector.load %arg5[%c0_8, %c0_9] : memref<8x8xf32, #tpu.memory_space<vmem>>, vector<8x8xf32>
    %17 = arith.mulf %11, %16 : vector<8x8xf32>
    %18 = arith.mulf %17, %17 : vector<8x8xf32>
    %19 = arith.addf %3, %5 : f32
    %20 = vector.broadcast %19 : f32 to vector<8x8xf32>
    %21 = arith.mulf %20, %15 : vector<8x8xf32>
    %22 = vector.broadcast %4 : f32 to vector<8x8xf32>
    %23 = arith.mulf %22, %18 : vector<8x8xf32>
    %24 = arith.addf %21, %23 : vector<8x8xf32>
    %c0_10 = arith.constant 0 : index
    %c0_11 = arith.constant 0 : index
    %25 = vector.load %arg7[%c0_10, %c0_11] : memref<8x8xf32, #tpu.memory_space<vmem>>, vector<8x8xf32>
    %26 = arith.addf %25, %24 : vector<8x8xf32>
    %c0_12 = arith.constant 0 : index
    %c0_13 = arith.constant 0 : index
    %27 = vector.load %arg7[%c0_12, %c0_13] : memref<8x8xf32, #tpu.memory_space<vmem>>, vector<8x8xf32>
    tpu.vector_store %arg7[%c0_12, %c0_13], %26 {strides = array<i32>} : memref<8x8xf32, #tpu.memory_space<vmem>>, vector<8x8xf32>,
    %c0_i32_14 = arith.constant 0 : i32
    %28 = arith.cmpi eq, %arg0, %c0_i32_14 : i32
    %29 = arith.extui %28 : i1 to i32
    %c0_i32_15 = arith.constant 0 : i32
    %30 = arith.cmpi ne, %29, %c0_i32_15 : i32
    scf.if %30 {
      %c0_16 = arith.constant 0 : index
      %c0_17 = arith.constant 0 : index
      %31 = vector.load %arg7[%c0_16, %c0_17] : memref<8x8xf32, #tpu.memory_space<vmem>>, vector<8x8xf32>
      %32 = vector.shape_cast %31 : vector<8x8xf32> to vector<1x8x8xf32>
      %cst_18 = arith.constant dense<0.000000e+00> : vector<1xf32>
      %33 = vector.multi_reduction <add>, %32, %cst_18 [1, 2] : vector<1x8x8xf32> to vector<1xf32>
      %34 = vector.shape_cast %33 : vector<1xf32> to vector<1x1x1xf32>
      %35 = vector.extract %34[0, 0, 0] : f32 from vector<1x1x1xf32>
      %c0_19 = arith.constant 0 : index
      %c0_20 = arith.constant 0 : index
      %36 = memref.load %arg6[%c0_19, %c0_20] : memref<1x1xf32, #tpu.memory_space<smem>>
      memref.store %35, %arg6[%c0_19, %c0_20] : memref<1x1xf32, #tpu.memory_space<smem>>
    } else {
    }
    return
  }
  func.func @transform_0(%arg0: i32) -> i32 {
    %c0_i32 = arith.constant 0 : i32
    %c0_i32_0 = arith.constant 0 : i32
    return %c0_i32 : i32
  }
  func.func @transform_1(%arg0: i32) -> (i32, i32) {
    %c0_i32 = arith.constant 0 : i32
    %c0_i32_0 = arith.constant 0 : i32
    %c0_i32_1 = arith.constant 0 : i32
    return %c0_i32, %c0_i32_0 : i32, i32
  }
  func.func @transform_2(%arg0: i32) -> (i32, i32) {
    %c0_i32 = arith.constant 0 : i32
    %c0_i32_0 = arith.constant 0 : i32
    return %arg0, %c0_i32 : i32, i32
  }
  func.func @transform_3(%arg0: i32) -> (i32, i32) {
    %c0_i32 = arith.constant 0 : i32
    %c0_i32_0 = arith.constant 0 : i32
    return %arg0, %c0_i32 : i32, i32
  }
  func.func @transform_4(%arg0: i32) -> (i32, i32) {
    %c0_i32 = arith.constant 0 : i32
    %c0_i32_0 = arith.constant 0 : i32
    return %arg0, %c0_i32 : i32, i32
  }
  func.func @transform_5(%arg0: i32) -> (i32, i32) {
    %c0_i32 = arith.constant 0 : i32
    %c0_i32_0 = arith.constant 0 : i32
    %c0_i32_1 = arith.constant 0 : i32
    return %c0_i32, %c0_i32_0 : i32, i32
  }
}

</mosaic_0001>

<bundles_post_ra>
// kernel: tpu_custom_call.1
= control target key start
LH: loop header
LB: loop body
LE: loop exit
PB: predicated region body
PF: predicated region fallthrough
CT: control target
= control target key end

     0   :  { %10 = vsyncpa [#allocation5], 0  ;;  %s356_s0 = inlined_call_operand.hbm [shape: f32[3], index: 0, kind: input, shape index: {}]   ;;  %s357_s1 = inlined_call_operand.hbm [shape: f32[1,8], index: 1, kind: input, shape index: {}]   ;;  %s358_s2 = inlined_call_operand.hbm [shape: f32[8,8], index: 2, kind: input, shape index: {}]   ;;  %s359_s3 = inlined_call_operand.hbm [shape: f32[8,8], index: 3, kind: input, shape index: {}]   ;;  %s360_s4 = inlined_call_operand.hbm [shape: f32[8,8], index: 4, kind: input, shape index: {}]   ;;  %s361_s5 = inlined_call_operand.hbm [shape: f32[1,1], index: 5, kind: output, shape index: {}]  }
   0x1   :  { %11 = vsyncpa [#allocation4], 0 }
   0x2   :  { %12 = vsyncpa [#allocation9], 0 }
   0x3   :  { %13 = vsyncpa [#allocation12], 0  ;;  %s40_s20 = sshll.u32 %s358_s2, 4  ;;  %s41_s20 = int_to_ptr.hbm [resolvable:$true] %s40_s20 }
   0x4   :  { %14 = vsyncpa [#allocation6], 0  ;;  %s298_s21 = smov [#allocation8]   ;;  %s20_s25 = sshll.u32 %s356_s0, 4  ;;  %s21_s25 = int_to_ptr.hbm [resolvable:$true] %s20_s25 }
   0x5   :  { %s42_s22 = sshll.u32 %s298_s21, 4  ;;  %s299_s26 = smov [#allocation3]   ;;  %s43_s22 = int_to_ptr.vmem [resolvable:$true] %s42_s22 }
   0x6   :  { %45 = dma.hbm_to_vmem [thread:$0]  %s41_s20, 128, %s43_s22, [#allocation9]  }
   0x7   :  { %23 = dma.hbm_to_smem %s21_s25, 16, %s299_s26, [#allocation5]  }
   0x8   :  { %s29_s29 = sshll.u32 %s357_s1, 4  ;;  %s300_s30 = smov [#allocation7]   ;;  %s30_s29 = int_to_ptr.hbm [resolvable:$true] %s29_s29 }
   0x9   :  { %s31_s2 = sshll.u32 %s300_s30, 4  ;;  %s51_s8 = sshll.u32 %s359_s3, 4  ;;  %s32_s2 = int_to_ptr.vmem [resolvable:$true] %s31_s2  ;;  %s52_s8 = int_to_ptr.hbm [resolvable:$true] %s51_s8 }
   0xa   :  { %34 = dma.hbm_to_vmem [thread:$0]  %s30_s29, 16, %s32_s2, [#allocation4]  }
   0xb   :  { %s301_s9 = smov [#allocation10]   ;;  %s62_s12 = sshll.u32 %s360_s4, 4  ;;  %s63_s12 = int_to_ptr.hbm [resolvable:$true] %s62_s12 }
   0xc   :  { %s53_s0 = sshll.u32 %s301_s9, 4  ;;  %s302_s1 = smov [#allocation11]   ;;  %s54_s0 = int_to_ptr.vmem [resolvable:$true] %s53_s0 }
   0xd   :  { %56 = dma.hbm_to_vmem [thread:$0]  %s52_s8, 128, %s54_s0, [#allocation9]  }
   0xe   :  { %s64_s13 = sshll.u32 %s302_s1, 4  ;;  %s65_s13 = int_to_ptr.vmem [resolvable:$true] %s64_s13 }
   0xf   :  { %67 = dma.hbm_to_vmem [thread:$0]  %s63_s12, 128, %s65_s13, [#allocation12]  }
  0x10   :  { %288 = dma.done.wait [#allocation5], 16  }
  0x11   :  { %289 = vsyncadd [#allocation5], 4294967280 }
  0x12   :  { %290 = dma.done.wait [#allocation4], 16  }
  0x13   :  { %291 = vsyncadd [#allocation4], 4294967280 }
  0x14   :  { %292 = dma.done.wait [#allocation9], 256  }
  0x15   :  { %293 = vsyncadd [#allocation9], 4294967040 }
  0x16   :  { %294 = dma.done.wait [#allocation12], 128  }
  0x17   :  { %295 = vsyncadd [#allocation12], 4294967168 }
  0x18   :  { %88 = sfence }
  0x19   :  { %vm93_vm0 = vcmask 64512   ;;  %s95_s3 = sld [smem:[#allocation3]]  ;;  %v98_v0 = vld [vmem:[#allocation10] sm:$0xff]  ;;  %v99_v1 = vld [vmem:[#allocation8] sm:$0xff]  ;;  %v303_v2 = vmov 0.0   ;;  %v108_v5 = vld [vmem:[#allocation11] sm:$0xff] }
  0x1a   :  { %94 = vst.msk [vmem:[#allocation2] sm:$0xff] %vm93_vm0, %v303_v2  ;;  %s156_s4 = sld [smem:[#allocation3 + $0x1]]  ;;  %vm100_vm1 = vcmp.gt.f32.partialorder %v99_v1, 0.0  ;;  %v167_v4 = vld [vmem:[#allocation7] ss:$0 sm:$0xff]  ;;  %s142_s18 = sshll.u32 %s361_s5, 4  ;;  %s143_s18 = int_to_ptr.hbm [resolvable:$true] %s142_s18 }
  0x1b   :  { %s157_s14 = sld [smem:[#allocation3 + $0x2]]  ;;  %v101_v3 = vsel %vm100_vm1, %v98_v0, 0.0  ;;  %s304_s20 = smov [#allocation13]  }
  0x1c   :  { %v109_v6 = vmul.f32 %v108_v5, %v101_v3  ;;  %v106_v7 = vsub.f32 %v101_v3, %v167_v4 }
  0x1e   :  { %v110_v8 = vmul.f32 %v109_v6, %v109_v6  ;;  %v107_v9 = vmul.f32 %v106_v7, %v106_v7 }
  0x20   :  { %v114_v10 = vstv %s156_s4 }
  0x21   :  { %s111_s15 = sadd.f32 %s157_s14, %s95_s3  ;;  %v115_v11 = vmul.f32 %v114_v10, %v110_v8  ;;  %v117_v14 = vld [vmem:[#allocation2] sm:$0xff] }
  0x23   :  { %v112_v12 = vstv %s111_s15 }
  0x24   :  { %v113_v13 = vmul.f32 %v112_v12, %v107_v9 }
  0x26   :  { %v116_v15 = vadd.f32 %v115_v11, %v113_v13 }
  0x28   :  { %v118_v16 = vadd.f32 %v117_v14, %v116_v15 }
  0x2a   :  { %120 = vst.msk [vmem:[#allocation2] sm:$0xff] %vm93_vm0, %v118_v16 }
  0x31   :  { %v124_v17 = vld [vmem:[#allocation2] sm:$0xff] }
  0x32   :  { %v125_v18 = vsel %vm93_vm0, %v124_v17, 0.0 }
  0x33   :  { %126 = vadd.xlane.f32.xlu0 %v125_v18 }
  0xa6   :  { %v127_v19 = vpop.xlane.xlu0 %126 }
  0xa7   :  { %v128_v20 = vrot.slane %v127_v19, 4 }
  0xa9   :  { %v129_v21 = vadd.f32 %v128_v20, %v127_v19 }
  0xab   :  { %v130_v22 = vrot.slane %v129_v21, 2 }
  0xad   :  { %v131_v23 = vadd.f32 %v130_v22, %v129_v21 }
  0xaf   :  { %v132_v24 = vrot.slane %v131_v23, 1 }
  0xb1   :  { %v133_v25 = vadd.f32 %v132_v24, %v131_v23 }
  0xb3   :  { %158 = vpush %v133_v25 }
  0xe4   :  { %s159_s19 = spop %158 }
  0xe5   :  { %136 = sst [smem:[#allocation13]] %s159_s19 }
  0xe6   :  { %145 = dma.smem_to_hbm %s304_s20, 16, %s143_s18, [#allocation6]  }
  0xe7   :  { %296 = dma.done.wait [#allocation6], 16  }
  0xe8   :  { %297 = vsyncadd [#allocation6], 4294967280 }
  0xe9   :  { %150 = sfence }
  0xea   :  { %151 = vsyncpa [#allocation4], 1 }
  0xeb   :  { %152 = vsyncpa [#allocation9], 1 }
  0xec   :  { %153 = vsyncpa [#allocation12], 1 }
  0xed   :  { %154 = vsyncpa [#allocation5], 1 }
  0xee   :  { %155 = vsyncpa [#allocation6], 1 }

</bundles_post_ra>
